<compile_context>
chip_gen: v7x
topology: tpu7x:2x2x1
jax: 0.10.0
libtpu: 0.0.40
codegen_flags: <defaults>
</compile_context>

<pallas_src>
import functools

import jax
import jax.numpy as jnp
from jax.experimental import pallas as pl
from jax.experimental.pallas import tpu as pltpu


def _round_up(x, m):
    return ((x + m - 1) // m) * m


def _drnet_kernel(iters, x_ref, wu_ref, wblk_ref, out_ref):
    """Fused DRNet message passing.

    x_ref   : (Np, Kp)  bf16 packed [xs | xo | xr | 1 | 0-pad]
    wu_ref  : (Kp, Sp)  bf16 block-diagonal unary weights (w_r, w_a, w_a) plus
                        a folded-bias row aligned with the ones-column of x.
    wblk_ref: (Sp, Sp)  bf16 cross-term block matrix (zero where no edge).
    out_ref : (Np, Sp)  f32 packed pre-activation of the final iteration;
                        state layout is [qr | qs | qo].
    """
    # Loop-invariant unary terms with all biases folded in: one matmul.
    # f32 accumulation (v5e VPU has no bf16 ALU for the adds / ReLU below).
    u = jnp.dot(x_ref[...], wu_ref[...], preferred_element_type=jnp.float32)

    if iters == 1:
        # Single iteration: qr is returned without ReLU -> raw pre-activation.
        out_ref[...] = u
        return

    # Iteration 0 peeled: initial state is zero, so cross terms vanish.
    q = jnp.maximum(u, 0.0)
    w_blk = wblk_ref[...]

    # Iterations 1 .. iters-2: one 128x128 block matmul replaces 6 tiny ones.
    # Static unroll is fine at iters=5; switch to lax.fori_loop(unroll=True)
    # if iters ever becomes large / config-driven.
    for _ in range(iters - 2):
        cross = jnp.dot(q.astype(jnp.bfloat16), w_blk,
                        preferred_element_type=jnp.float32)
        q = jnp.maximum(u + cross, 0.0)

    # Last iteration: qr gets NO ReLU.  Only qr is consumed downstream, so we
    # store the raw pre-activation tile lane-dense and slice in the wrapper.
    out_ref[...] = u + jnp.dot(q.astype(jnp.bfloat16), w_blk,
                               preferred_element_type=jnp.float32)


def _pack_weights(params):
    """Build the two lane-dense bf16 weight slabs once per parameter set."""
    f32 = jnp.float32
    wa, ba = params["w_a"]
    wr, br = params["w_r"]
    wsr, bsr = params["w_sr"]
    wso, bso = params["w_so"]
    wrs, brs = params["w_rs"]
    wro, bro = params["w_ro"]
    wos, bos = params["w_os"]
    wor, bor = params["w_or"]

    of = wa.shape[0]          # obj_feats
    rf = wr.shape[0]          # rel_feats
    no = wa.shape[1]          # num_objs
    nr = wr.shape[1]          # num_rels

    S = nr + 2 * no           # packed state width [qr | qs | qo]
    K = 2 * of + rf + 1       # packed input width [xs | xo | xr | 1]
    s_pad = _round_up(S, 128)
    k_pad = _round_up(K, 128)

    # State column offsets: qr is lane-0 aligned (cheap output slice).
    c_qr, c_qs, c_qo = 0, nr, nr + no

    # ---- unary slab: block-diag [w_r ; w_a ; w_a] + folded-bias row ---------
    w_u = jnp.zeros((k_pad, s_pad), f32)
    w_u = w_u.at[0:of, c_qs:c_qs + no].set(wa)                       # xs -> qs
    w_u = w_u.at[of:2 * of, c_qo:c_qo + no].set(wa)                  # xo -> qo
    w_u = w_u.at[2 * of:2 * of + rf, c_qr:c_qr + nr].set(wr)         # xr -> qr
    b_row = jnp.zeros((s_pad,), f32)
    b_row = b_row.at[c_qr:c_qr + nr].set((br + brs + bro)[0])
    b_row = b_row.at[c_qs:c_qs + no].set((ba + bsr + bso)[0])
    b_row = b_row.at[c_qo:c_qo + no].set((ba + bos + bor)[0])
    w_u = w_u.at[K - 1, :].set(b_row)            # aligned with the ones column

    # ---- cross-term block matrix:  pre = u + [qr|qs|qo] @ w_blk -------------
    w_blk = jnp.zeros((s_pad, s_pad), f32)
    # qr rows -> qs_out (w_sr) and qo_out (w_or)
    w_blk = w_blk.at[c_qr:c_qr + nr, c_qs:c_qs + no].set(wsr)
    w_blk = w_blk.at[c_qr:c_qr + nr, c_qo:c_qo + no].set(wor)
    # qs rows -> qr_out (w_rs) and qo_out (w_os)
    w_blk = w_blk.at[c_qs:c_qs + no, c_qr:c_qr + nr].set(wrs)
    w_blk = w_blk.at[c_qs:c_qs + no, c_qo:c_qo + no].set(wos)
    # qo rows -> qr_out (w_ro) and qs_out (w_so)
    w_blk = w_blk.at[c_qo:c_qo + no, c_qr:c_qr + nr].set(wro)
    w_blk = w_blk.at[c_qo:c_qo + no, c_qs:c_qs + no].set(wso)

    # bf16 slabs for the MXU; zero pad blocks stay exactly zero after the cast,
    # which keeps the ReLU-on-padding invariant intact.
    w_u = w_u.astype(jnp.bfloat16)
    w_blk = w_blk.astype(jnp.bfloat16)

    dims = dict(of=of, rf=rf, no=no, nr=nr, K=K, k_pad=k_pad, s_pad=s_pad)
    return w_u, w_blk, dims


def make_drnet_forward(params, *, iters=5):
    """Pack weights ONCE and return a jitted forward closing over the slabs."""
    w_u, w_blk, dims = _pack_weights(params)
    nr = dims["nr"]
    K = dims["K"]
    k_pad = dims["k_pad"]
    s_pad = dims["s_pad"]
    kernel = functools.partial(_drnet_kernel, iters)

    @jax.jit
    def forward(xs, xo, xr):
        n = xs.shape[0]
        n_pad = _round_up(max(n, 8), 8)
        # Single concat + pad builds the lane-dense [xs | xo | xr | 1] slab.
        ones = jnp.ones((n, 1), jnp.float32)
        x = jnp.concatenate([xs, xo, xr, ones], axis=1)
        x_pack = jnp.pad(x, ((0, n_pad - n), (0, k_pad - K))).astype(jnp.bfloat16)

        out = pl.pallas_call(
            kernel,
            out_shape=jax.ShapeDtypeStruct((n_pad, s_pad), jnp.float32),
            # Small problem: no grid; each operand is one full-array VMEM block.
            in_specs=[pl.BlockSpec(memory_space=pltpu.MemorySpace.VMEM)] * 3,
            out_specs=pl.BlockSpec(memory_space=pltpu.MemorySpace.VMEM),
        )(x_pack, w_u, w_blk)

        # qr is lane-0 aligned in the packed state -> cheap, unshifted slice.
        return out[:n, :nr]

    return forward


def _make_linear(key, in_f, out_f):
    """Deterministic synthetic nn.Linear params, as (W^T (in,out), b (1,out))."""
    kw, kb = jax.random.split(key)
    bound = 1.0 / jnp.sqrt(jnp.float32(in_f))
    w = jax.random.uniform(kw, (out_f, in_f), jnp.float32, -bound, bound)
    b = jax.random.uniform(kb, (out_f,), jnp.float32, -bound, bound)
    return w.T, b.reshape(1, out_f)


def _reference(xs, xo, xr, params, iters=5):
    """Pure-JAX f32 reference mirroring the PyTorch forward."""
    def lin(x, p):
        return x @ p[0] + p[1]
    num_objs = params["w_a"][0].shape[1]
    num_rels = params["w_r"][0].shape[1]
    qs = jnp.zeros((xs.shape[0], num_objs), jnp.float32)
    qo = jnp.zeros((xo.shape[0], num_objs), jnp.float32)
    qr = jnp.zeros((xr.shape[0], num_rels), jnp.float32)
    for i in range(iters):
        qs_out = lin(xs, params["w_a"]) + lin(qr, params["w_sr"]) + lin(qo, params["w_so"])
        qr_out = lin(xr, params["w_r"]) + lin(qs, params["w_rs"]) + lin(qo, params["w_ro"])
        qo_out = lin(xo, params["w_a"]) + lin(qs, params["w_os"]) + lin(qr, params["w_or"])
        qs = jax.nn.relu(qs_out)
        qr = qr_out if i == iters - 1 else jax.nn.relu(qr_out)
        qo = jax.nn.relu(qo_out)
    return qr


if __name__ == "__main__":
    # Small shapes consistent with the module: per-proposal feature vectors.
    # In production, batch all proposal triples of an image (N >> 8) into one
    # call to amortize the fixed launch/DMA overhead.
    N = 8
    OBJ_FEATS = 32
    REL_FEATS = 40
    NUM_OBJS = 24
    NUM_RELS = 16
    ITERS = 5

    root = jax.random.PRNGKey(0)
    keys = jax.random.split(root, 12)

    xs = jax.random.normal(keys[0], (N, OBJ_FEATS), jnp.float32)
    xo = jax.random.normal(keys[1], (N, OBJ_FEATS), jnp.float32)
    xr = jax.random.normal(keys[2], (N, REL_FEATS), jnp.float32)

    params = {
        "w_a":  _make_linear(keys[3],  OBJ_FEATS, NUM_OBJS),
        "w_r":  _make_linear(keys[4],  REL_FEATS, NUM_RELS),
        "w_sr": _make_linear(keys[5],  NUM_RELS,  NUM_OBJS),
        "w_so": _make_linear(keys[6],  NUM_OBJS,  NUM_OBJS),
        "w_rs": _make_linear(keys[7],  NUM_OBJS,  NUM_RELS),
        "w_ro": _make_linear(keys[8],  NUM_OBJS,  NUM_RELS),
        "w_os": _make_linear(keys[9],  NUM_OBJS,  NUM_OBJS),
        "w_or": _make_linear(keys[10], NUM_RELS,  NUM_OBJS),
    }

    # Pack weights once; reuse the jitted forward for every call.
    drnet_forward = make_drnet_forward(params, iters=ITERS)

    qr = drnet_forward(xs, xo, xr)
    qr = jax.block_until_ready(qr)

    ref = _reference(xs, xo, xr, params, iters=ITERS)
    assert qr.shape == (N, NUM_RELS)
    # bf16 inputs/weights with f32 accumulation: loosened tolerance vs the
    # f32 reference (expected rounding, not a bug).
    assert jnp.allclose(qr, ref, atol=5e-2, rtol=5e-2), \
        "Pallas kernel mismatch vs reference"

    print("KERNEL_OK")
</pallas_src>

<mosaic_0001>
module attributes {stable_mosaic.version = 11 : i64} {
  func.func @_drnet_kernel(%arg0: memref<8x128xbf16, #tpu.memory_space<vmem>>, %arg1: memref<128x128xbf16, #tpu.memory_space<vmem>>, %arg2: memref<128x128xbf16, #tpu.memory_space<vmem>>, %arg3: memref<8x128xf32, #tpu.memory_space<vmem>>) attributes {dimension_semantics = [], scalar_prefetch = 0 : i64, scratch_operands = 0 : i64, tpu.core_type = #tpu.core_type<tc>} {
    %c0 = arith.constant 0 : index
    %c0_0 = arith.constant 0 : index
    %0 = vector.load %arg0[%c0, %c0_0] : memref<8x128xbf16, #tpu.memory_space<vmem>>, vector<8x128xbf16>
    %c0_1 = arith.constant 0 : index
    %c0_2 = arith.constant 0 : index
    %1 = vector.load %arg1[%c0_1, %c0_2] : memref<128x128xbf16, #tpu.memory_space<vmem>>, vector<128x128xbf16>
    %cst = arith.constant dense<0.000000e+00> : vector<8x128xf32>
    %2 = tpu.matmul %0, %1, %cst {dimension_numbers = #tpu.dot_dimension_numbers<[1], [0], [0], [1], [0, 0, 1, 1], [], []>} : vector<8x128xbf16>, vector<128x128xbf16>, vector<8x128xf32> -> vector<8x128xf32>
    %cst_3 = arith.constant 0.000000e+00 : f32
    %3 = vector.broadcast %cst_3 : f32 to vector<8x128xf32>
    %4 = arith.maximumf %2, %3 : vector<8x128xf32>
    %c0_4 = arith.constant 0 : index
    %c0_5 = arith.constant 0 : index
    %5 = vector.load %arg2[%c0_4, %c0_5] : memref<128x128xbf16, #tpu.memory_space<vmem>>, vector<128x128xbf16>
    %6 = arith.truncf %4 : vector<8x128xf32> to vector<8x128xbf16>
    %cst_6 = arith.constant dense<0.000000e+00> : vector<8x128xf32>
    %7 = tpu.matmul %6, %5, %cst_6 {dimension_numbers = #tpu.dot_dimension_numbers<[1], [0], [0], [1], [0, 0, 1, 1], [], []>} : vector<8x128xbf16>, vector<128x128xbf16>, vector<8x128xf32> -> vector<8x128xf32>
    %8 = arith.addf %2, %7 : vector<8x128xf32>
    %cst_7 = arith.constant 0.000000e+00 : f32
    %9 = vector.broadcast %cst_7 : f32 to vector<8x128xf32>
    %10 = arith.maximumf %8, %9 : vector<8x128xf32>
    %11 = arith.truncf %10 : vector<8x128xf32> to vector<8x128xbf16>
    %cst_8 = arith.constant dense<0.000000e+00> : vector<8x128xf32>
    %12 = tpu.matmul %11, %5, %cst_8 {dimension_numbers = #tpu.dot_dimension_numbers<[1], [0], [0], [1], [0, 0, 1, 1], [], []>} : vector<8x128xbf16>, vector<128x128xbf16>, vector<8x128xf32> -> vector<8x128xf32>
    %13 = arith.addf %2, %12 : vector<8x128xf32>
    %cst_9 = arith.constant 0.000000e+00 : f32
    %14 = vector.broadcast %cst_9 : f32 to vector<8x128xf32>
    %15 = arith.maximumf %13, %14 : vector<8x128xf32>
    %16 = arith.truncf %15 : vector<8x128xf32> to vector<8x128xbf16>
    %cst_10 = arith.constant dense<0.000000e+00> : vector<8x128xf32>
    %17 = tpu.matmul %16, %5, %cst_10 {dimension_numbers = #tpu.dot_dimension_numbers<[1], [0], [0], [1], [0, 0, 1, 1], [], []>} : vector<8x128xbf16>, vector<128x128xbf16>, vector<8x128xf32> -> vector<8x128xf32>
    %18 = arith.addf %2, %17 : vector<8x128xf32>
    %cst_11 = arith.constant 0.000000e+00 : f32
    %19 = vector.broadcast %cst_11 : f32 to vector<8x128xf32>
    %20 = arith.maximumf %18, %19 : vector<8x128xf32>
    %21 = arith.truncf %20 : vector<8x128xf32> to vector<8x128xbf16>
    %cst_12 = arith.constant dense<0.000000e+00> : vector<8x128xf32>
    %22 = tpu.matmul %21, %5, %cst_12 {dimension_numbers = #tpu.dot_dimension_numbers<[1], [0], [0], [1], [0, 0, 1, 1], [], []>} : vector<8x128xbf16>, vector<128x128xbf16>, vector<8x128xf32> -> vector<8x128xf32>
    %23 = arith.addf %2, %22 : vector<8x128xf32>
    %c0_13 = arith.constant 0 : index
    %c0_14 = arith.constant 0 : index
    %24 = vector.load %arg3[%c0_13, %c0_14] : memref<8x128xf32, #tpu.memory_space<vmem>>, vector<8x128xf32>
    tpu.vector_store %arg3[%c0_13, %c0_14], %23 {strides = array<i32>} : memref<8x128xf32, #tpu.memory_space<vmem>>, vector<8x128xf32>,
    return
  }
}

</mosaic_0001>

<bundles_post_ra>
// kernel: forward.1
= control target key start
LH: loop header
LB: loop body
LE: loop exit
PB: predicated region body
PF: predicated region fallthrough
CT: control target
= control target key end

     0   :  { %8 = vsyncpa [#allocation3], 0  ;;  %s794_s0 = inlined_call_operand.vmem [shape: bf16[8,128], index: 0, kind: input, shape index: {}]   ;;  %s795_s1 = inlined_call_operand.hbm [shape: bf16[128,128], index: 1, kind: input, shape index: {}]   ;;  %s796_s2 = inlined_call_operand.vmem [shape: bf16[128,128], index: 2, kind: input, shape index: {}]   ;;  %s797_s3 = inlined_call_operand.hbm [shape: f32[8,128], index: 3, kind: output, shape index: {}]  }
   0x1   :  { %9 = vsyncpa [#allocation4], 0  ;;  %s618_s12 = smov [#allocation2]   ;;  %s570_s16 = scalar_lea.hbm %s795_s1, 1024 }
   0x2   :  { %s17_s13 = sshll.u32 %s618_s12, 4  ;;  %p571_p0 = scmp.ne.s32.totalorder %s795_s1, %s570_s16  ;;  %s18_s13 = int_to_ptr.vmem [resolvable:$true] %s17_s13 }
   0x3   :  { %p574_p1 = scmp.lt.u32.totalorder %s570_s16, %s795_s1 }
   0x5   :  { %p576_p2 = pnand %p574_p1, %p571_p0 }
   0x7   :  { %579 = shalt.err (!%p576_p2)
}
   0x8   :  { %s580_s21 = scalar_lea.vmem %s18_s13, 1024  ;;  %p585_p4 = scmp.lt.s32.totalorder %s18_s13, %s18_s13 }
   0x9   :  { %p581_p3 = scmp.ne.s32.totalorder %s18_s13, %s580_s21  ;;  %p586_p5 = scmp.lt.s32.totalorder %s580_s21, %s580_s21 }
   0xb   :  { %p587_p6 = por %p586_p5, %p585_p4 }
   0xd   :  { %p588_p7 = pnand %p587_p6, %p581_p3 }
   0xf   :  { %591 = shalt.err (!%p588_p7)
}
  0x10   :  { %s619_s22 = smov 64   ;;  %s620_s23 = smov 4  }
  0x11   :  { %23 = dma.hbm_to_vmem [thread:$0]  %s795_s1, 1024, %s18_s13, [#allocation3], %s619_s22, %s619_s22, %s620_s23  }
  0x12   :  { %614 = dma.done.wait [#allocation3], 1024  }
  0x13   :  { %615 = vsyncadd [#allocation3], 4294966272  ;;  %v621_v0 = vmov 0.0   ;;  %vm622_vm0 = vmmov 0   ;;  %v554_v1 = vld [vmem:[#allocation2] sm:$0xff]   ;;  %v555_v2 = vld [vmem:[#allocation2 + $0x8] sm:$0xff]  }
  0x14   :  { %448 = vmatprep.subr.bf16.mxu0 %v621_v0  ;;  %464 = vmatprep.mubr.msk.bf16.mxu0 %vm622_vm0, %v621_v0  ;;  %v556_v3 = vld [vmem:[#allocation2 + $0x10] sm:$0xff]   ;;  %v667_v4 = vld [vmem:[%s796_s2] sm:$0xff]   ;;  %v557_v5 = vld [vmem:[#allocation2 + $0x18] sm:$0xff]  }
  0x15   :  { %468 = vmatprep.subr.bf16.mxu1 %v621_v0  ;;  %484 = vmatprep.mubr.msk.bf16.mxu1 %vm622_vm0, %v621_v0  ;;  %v674_v6 = vld [vmem:[%s796_s2 + $0x8] sm:$0xff]   ;;  %v558_v7 = vld [vmem:[#allocation2 + $0x20] sm:$0xff]   ;;  %v682_v8 = vld [vmem:[%s796_s2 + $0x10] sm:$0xff]  }
  0x16   :  { %449 = vmatpush3.bf16.msra.mxu0 %v554_v1  ;;  %469 = vmatpush3.bf16.msra.mxu1 %v667_v4  ;;  %v559_v9 = vld [vmem:[#allocation2 + $0x28] sm:$0xff]   ;;  %v690_v10 = vld [vmem:[%s796_s2 + $0x18] sm:$0xff]   ;;  %v560_v11 = vld [vmem:[#allocation2 + $0x30] sm:$0xff]  }
  0x17   :  { %450 = vmatprep.subr.bf16.mxu0 %v621_v0  ;;  %470 = vmatprep.subr.bf16.mxu1 %v621_v0  ;;  %v698_v12 = vld [vmem:[%s796_s2 + $0x20] sm:$0xff]   ;;  %v561_v13 = vld [vmem:[#allocation2 + $0x38] sm:$0xff]   ;;  %v706_v14 = vld [vmem:[%s796_s2 + $0x28] sm:$0xff]  }
  0x18   :  { %v30_v15 = vld [vmem:[%s794_s0] sm:$0xf]  ;;  %v716_v16 = vld [vmem:[%s796_s2 + $0x30] sm:$0xff]   ;;  %v569_v17 = vld [vmem:[%s796_s2 + $0x38] sm:$0xff]   ;;  %s623_s2 = smov [#allocation5]  }
  0x19   :  { %s378_s15 = sshll.u32 %s623_s2, 4  ;;  %s379_s15 = int_to_ptr.vmem [resolvable:$true] %s378_s15 }
  0x1a   :  { %451 = vmatpush3.bf16.msra.mxu0 %v555_v2  ;;  %471 = vmatpush3.bf16.msra.mxu1 %v674_v6  ;;  %s592_s16 = scalar_lea.vmem %s379_s15, 128  ;;  %p597_p9 = scmp.lt.s32.totalorder %s379_s15, %s379_s15 }
  0x1b   :  { %452 = vmatprep.subr.bf16.mxu0 %v621_v0  ;;  %472 = vmatprep.subr.bf16.mxu1 %v621_v0  ;;  %p593_p8 = scmp.ne.s32.totalorder %s379_s15, %s592_s16  ;;  %p598_p10 = scmp.lt.s32.totalorder %s592_s16, %s592_s16 }
  0x1d   :  { %p599_p11 = por %p598_p10, %p597_p9 }
  0x1e   :  { %453 = vmatpush3.bf16.msra.mxu0 %v556_v3  ;;  %473 = vmatpush3.bf16.msra.mxu1 %v682_v8 }
  0x1f   :  { %454 = vmatprep.subr.bf16.mxu0 %v621_v0  ;;  %474 = vmatprep.subr.bf16.mxu1 %v621_v0  ;;  %p600_p12 = pnand %p599_p11, %p593_p8 }
  0x22   :  { %455 = vmatpush3.bf16.msra.mxu0 %v557_v5  ;;  %475 = vmatpush3.bf16.msra.mxu1 %v690_v10 }
  0x23   :  { %456 = vmatprep.subr.bf16.mxu0 %v621_v0  ;;  %476 = vmatprep.subr.bf16.mxu1 %v621_v0 }
  0x26   :  { %457 = vmatpush3.bf16.msra.mxu0 %v558_v7  ;;  %477 = vmatpush3.bf16.msra.mxu1 %v698_v12 }
  0x27   :  { %458 = vmatprep.subr.bf16.mxu0 %v621_v0  ;;  %478 = vmatprep.subr.bf16.mxu1 %v621_v0 }
  0x2a   :  { %459 = vmatpush3.bf16.msra.mxu0 %v559_v9  ;;  %479 = vmatpush3.bf16.msra.mxu1 %v706_v14 }
  0x2b   :  { %460 = vmatprep.subr.bf16.mxu0 %v621_v0  ;;  %480 = vmatprep.subr.bf16.mxu1 %v621_v0 }
  0x2e   :  { %461 = vmatpush3.bf16.msra.mxu0 %v560_v11  ;;  %481 = vmatpush3.bf16.msra.mxu1 %v716_v16 }
  0x2f   :  { %462 = vmatprep.subr.bf16.mxu0 %v621_v0  ;;  %482 = vmatprep.subr.bf16.mxu1 %v621_v0 }
  0x32   :  { %463 = vmatpush3.bf16.msra.mxu0 %v561_v13  ;;  %483 = vmatpush3.bf16.msra.mxu1 %v569_v17 }
  0x33   :  { %488 = vmatprep.subr.bf16.mxu0 %v621_v0  ;;  %508 = vmatprep.subr.bf16.mxu1 %v621_v0 }
  0x35   :  { %465 = vmatmul.mubr.bf16.vlgmr.msra.gmra.mrb[0].mxu0 %v30_v15 }
  0x36   :  { %489 = vmatpush3.bf16.msra.mxu0 %v667_v4  ;;  %504 = vmatprep.mubr.msk.bf16.mxu0 %vm622_vm0, %v621_v0 }
  0x37   :  { %490 = vmatprep.subr.bf16.mxu0 %v621_v0 }
  0x3a   :  { %491 = vmatpush3.bf16.msra.mxu0 %v674_v6 }
  0x3b   :  { %492 = vmatprep.subr.bf16.mxu0 %v621_v0 }
  0x3e   :  { %493 = vmatpush3.bf16.msra.mxu0 %v682_v8 }
  0x3f   :  { %494 = vmatprep.subr.bf16.mxu0 %v621_v0 }
  0x42   :  { %495 = vmatpush3.bf16.msra.mxu0 %v690_v10 }
  0x43   :  { %496 = vmatprep.subr.bf16.mxu0 %v621_v0 }
  0x46   :  { %497 = vmatpush3.bf16.msra.mxu0 %v698_v12 }
  0x47   :  { %498 = vmatprep.subr.bf16.mxu0 %v621_v0 }
  0x4a   :  { %499 = vmatpush3.bf16.msra.mxu0 %v706_v14 }
  0x4b   :  { %500 = vmatprep.subr.bf16.mxu0 %v621_v0 }
  0x4e   :  { %501 = vmatpush3.bf16.msra.mxu0 %v716_v16 }
  0x4f   :  { %502 = vmatprep.subr.bf16.mxu0 %v621_v0 }
  0x52   :  { %503 = vmatpush3.bf16.msra.mxu0 %v569_v17 }
  0x53   :  { %528 = vmatprep.subr.bf16.mxu0 %v621_v0 }
 0x108   :  { %v743_v18 = vpop.f32.mrb[0].mxu0 }
 0x109   :  { %v466_v19 = vpop.f32.mrb[1].mxu0  ;;  %v135_v20 = vmax.f32 %v743_v18, 0.0 }
 0x10a   :  { %v132_v21 = vpop.f32.mrb[2].mxu0 }
 0x10b   :  { %v467_v22 = vpop.f32.mrb[3].mxu0  ;;  %v152_v23 = vpack.c.bf16 %v135_v20, %v135_v20 }
 0x10d   :  { %485 = vmatmul.mubr.bf16.vlgmr.msra.gmra.mrb[0].mxu1 %v152_v23 }
 0x10e   :  { %509 = vmatpush3.bf16.msra.mxu1 %v667_v4  ;;  %524 = vmatprep.mubr.msk.bf16.mxu1 %vm622_vm0, %v621_v0 }
 0x10f   :  { %510 = vmatprep.subr.bf16.mxu1 %v621_v0 }
 0x112   :  { %511 = vmatpush3.bf16.msra.mxu1 %v674_v6 }
 0x113   :  { %512 = vmatprep.subr.bf16.mxu1 %v621_v0 }
 0x116   :  { %513 = vmatpush3.bf16.msra.mxu1 %v682_v8 }
 0x117   :  { %514 = vmatprep.subr.bf16.mxu1 %v621_v0 }
 0x11a   :  { %515 = vmatpush3.bf16.msra.mxu1 %v690_v10 }
 0x11b   :  { %516 = vmatprep.subr.bf16.mxu1 %v621_v0 }
 0x11e   :  { %517 = vmatpush3.bf16.msra.mxu1 %v698_v12 }
 0x11f   :  { %518 = vmatprep.subr.bf16.mxu1 %v621_v0 }
 0x122   :  { %519 = vmatpush3.bf16.msra.mxu1 %v706_v14 }
 0x123   :  { %520 = vmatprep.subr.bf16.mxu1 %v621_v0 }
 0x126   :  { %521 = vmatpush3.bf16.msra.mxu1 %v716_v16 }
 0x127   :  { %522 = vmatprep.subr.bf16.mxu1 %v621_v0 }
 0x12a   :  { %523 = vmatpush3.bf16.msra.mxu1 %v569_v17 }
 0x1e0   :  { %v235_v24 = vpop.f32.mrb[0].mxu1 }
 0x1e1   :  { %v241_v25 = vadd.f32 %v235_v24, %v743_v18  ;;  %v486_v26 = vpop.f32.mrb[1].mxu1 }
 0x1e2   :  { %v238_v27 = vpop.f32.mrb[2].mxu1 }
 0x1e3   :  { %v242_v28 = vmax.f32 %v241_v25, 0.0  ;;  %v487_v29 = vpop.f32.mrb[3].mxu1 }
 0x1e5   :  { %v243_v30 = vpack.c.bf16 %v242_v28, %v242_v28 }
 0x1e7   :  { %505 = vmatmul.mubr.bf16.vlgmr.msra.gmra.mrb[4].mxu0 %v243_v30 }
 0x1e8   :  { %529 = vmatpush3.bf16.msra.mxu0 %v667_v4  ;;  %544 = vmatprep.mubr.msk.bf16.mxu0 %vm622_vm0, %v621_v0 }
 0x1e9   :  { %530 = vmatprep.subr.bf16.mxu0 %v621_v0 }
 0x1ec   :  { %531 = vmatpush3.bf16.msra.mxu0 %v674_v6 }
 0x1ed   :  { %532 = vmatprep.subr.bf16.mxu0 %v621_v0 }
 0x1f0   :  { %533 = vmatpush3.bf16.msra.mxu0 %v682_v8 }
 0x1f1   :  { %534 = vmatprep.subr.bf16.mxu0 %v621_v0 }
 0x1f4   :  { %535 = vmatpush3.bf16.msra.mxu0 %v690_v10 }
 0x1f5   :  { %536 = vmatprep.subr.bf16.mxu0 %v621_v0 }
 0x1f8   :  { %537 = vmatpush3.bf16.msra.mxu0 %v698_v12 }
 0x1f9   :  { %538 = vmatprep.subr.bf16.mxu0 %v621_v0 }
 0x1fc   :  { %539 = vmatpush3.bf16.msra.mxu0 %v706_v14 }
 0x1fd   :  { %540 = vmatprep.subr.bf16.mxu0 %v621_v0 }
 0x200   :  { %541 = vmatpush3.bf16.msra.mxu0 %v716_v16 }
 0x201   :  { %542 = vmatprep.subr.bf16.mxu0 %v621_v0 }
 0x204   :  { %543 = vmatpush3.bf16.msra.mxu0 %v569_v17 }
 0x2ba   :  { %v278_v31 = vpop.f32.mrb[4].mxu0 }
 0x2bb   :  { %v284_v32 = vadd.f32 %v278_v31, %v743_v18  ;;  %v506_v33 = vpop.f32.mrb[5].mxu0 }
 0x2bc   :  { %v281_v34 = vpop.f32.mrb[6].mxu0 }
 0x2bd   :  { %v285_v35 = vmax.f32 %v284_v32, 0.0  ;;  %v507_v36 = vpop.f32.mrb[7].mxu0 }
 0x2bf   :  { %v286_v37 = vpack.c.bf16 %v285_v35, %v285_v35 }
 0x2c1   :  { %525 = vmatmul.mubr.bf16.vlgmr.msra.gmra.mrb[4].mxu1 %v286_v37 }
 0x394   :  { %v321_v38 = vpop.f32.mrb[4].mxu1 }
 0x395   :  { %v327_v39 = vadd.f32 %v321_v38, %v743_v18  ;;  %v526_v40 = vpop.f32.mrb[5].mxu1 }
 0x396   :  { %v324_v41 = vpop.f32.mrb[6].mxu1 }
 0x397   :  { %v328_v42 = vmax.f32 %v327_v39, 0.0  ;;  %v527_v43 = vpop.f32.mrb[7].mxu1 }
 0x399   :  { %v329_v44 = vpack.c.bf16 %v328_v42, %v328_v42 }
 0x39b   :  { %545 = vmatmul.mubr.bf16.vlgmr.msra.gmra.mrb[8].mxu0 %v329_v44 }
 0x46e   :  { %v364_v45 = vpop.f32.mrb[8].mxu0 }
 0x46f   :  { %v370_v46 = vadd.f32 %v364_v45, %v743_v18  ;;  %v546_v47 = vpop.f32.mrb[9].mxu0 }
 0x470   :  { %v367_v48 = vpop.f32.mrb[10].mxu0 }
 0x471   :  { %371 = vst [vmem:[#allocation5] sm:$0xff] %v370_v46  ;;  %v547_v49 = vpop.f32.mrb[11].mxu0 }
 0x472   :  { %603 = shalt.err (!%p600_p12)
}
 0x473   :  { %s604_s19 = scalar_lea.hbm %s797_s3, 128 }
 0x474   :  { %p605_p13 = scmp.ne.s32.totalorder %s797_s3, %s604_s19  ;;  %p608_p0 = scmp.lt.u32.totalorder %s604_s19, %s797_s3 }
 0x476   :  { %p610_p1 = pnand %p608_p0, %p605_p13 }
 0x478   :  { %613 = shalt.err (!%p610_p1)
}
 0x479   :  { %381 = dma.vmem_to_hbm [thread:$0]  %s379_s15, 128, %s797_s3, [#allocation4]  }
 0x47a   :  { %616 = dma.done.wait [#allocation4], 128  }
 0x47b   :  { %617 = vsyncadd [#allocation4], 4294967168 }
 0x47c   :  { %385 = vsyncpa [#allocation3], 1 }
 0x47d   :  { %386 = vsyncpa [#allocation4], 1 }

</bundles_post_ra>
